<compile_context>
chip_gen: v7x
topology: tpu7x:2x2x1
jax: 0.10.0
libtpu: 0.0.40
codegen_flags: <defaults>
</compile_context>

<pallas_src>
import functools

import numpy as np
import jax
import jax.numpy as jnp
from jax.experimental import pallas as pl
from jax.experimental.pallas import tpu as pltpu


def _focus_conv_kernel(x_ref, w_ref, bias_ref, o_ref):
    # x_ref:    (Cin, TM)   channels on sublane, spatial pixels on lane
    # w_ref:    (Cout, Cin) 1x1-conv weight with BN scale folded in (resident)
    # bias_ref: (Cout, 1)   folded BN bias, f32 (resident)
    # o_ref:    (Cout, TM)  lane-dense output tile
    acc = jnp.dot(w_ref[...], x_ref[...], preferred_element_type=jnp.float32)
    y = acc + bias_ref[...]
    # Hardswish epilogue in f32 on all generations (v5e has no bf16 VPU).
    o_ref[...] = (y * jnp.clip(y + 3.0, 0.0, 6.0) * (1.0 / 6.0)).astype(o_ref.dtype)


def _space_to_depth(x):
    # x: (N, C, H, W) -> (N, 4C, H//2, W//2); channel order matches torch.cat
    a = x[..., ::2, ::2]
    b = x[..., 1::2, ::2]
    c = x[..., ::2, 1::2]
    d = x[..., 1::2, 1::2]
    return jnp.concatenate([a, b, c, d], axis=1)


def _select_tm(m, n, c_in, c_out, in_bytes, out_bytes, tm):
    """Largest lane tile whose double-buffered in+out blocks fit ~20 MiB,
    with >= 2 balanced spatial tiles when N == 1 (dual-TC chips)."""
    if m <= 256:
        return m                                   # full-extent tile; nothing to tune
    if tm is None:
        budget = 20 << 20                          # pipeline buffers only
        per_tm = 2 * (c_in * in_bytes + c_out * out_bytes)  # 2x-buffered in + out
        tm = max(128, min(32768, budget // per_tm))
    tm = max(128, (min(tm, m) // 128) * 128)
    n_tiles = -(-m // tm)
    if n == 1 and n_tiles < 2:
        n_tiles = 2                                # keep both v7x TensorCores busy
    # balance tiles, keep the lane tile a multiple of 128
    return ((-(-m // n_tiles) + 127) // 128) * 128


@functools.partial(jax.jit, static_argnames=("tm", "compute_dtype", "out_dtype"))
def focus_forward(x, w, bn_gamma, bn_beta, bn_mean, bn_var, *,
                  tm=None, eps=1e-5, compute_dtype=None, out_dtype=None):
    """x: (N, C1, H, W) NCHW.  w: (C2, 4*C1) 1x1 conv weight.  Returns (N, C2, H/2, W/2)."""
    n, c1, h, wdt = x.shape
    assert h % 2 == 0 and wdt % 2 == 0, "Focus requires even H and W"
    c_in = 4 * c1
    c_out = w.shape[0]
    h2, w2 = h // 2, wdt // 2
    m = h2 * w2

    cdt = np.dtype(compute_dtype if compute_dtype is not None else x.dtype)
    odt = np.dtype(out_dtype if out_dtype is not None else x.dtype)

    # --- glue: cast FIRST so the s2d intermediate is written & re-read in cdt,
    #           then space-to-depth (one fused XLA slice+concat pass), flatten.
    #           No transposes anywhere. ---
    xs = _space_to_depth(x.astype(cdt)).reshape(n, c_in, m)        # (N, Cin, M)

    # --- fold BN (eval mode): scale into the weight, bias as its own f32 operand ---
    scale = bn_gamma.astype(jnp.float32) * jax.lax.rsqrt(bn_var.astype(jnp.float32) + eps)
    wm = (w.astype(jnp.float32) * scale[:, None]).astype(cdt)      # (Cout, Cin)
    bias2d = (bn_beta.astype(jnp.float32)
              - bn_mean.astype(jnp.float32) * scale).reshape(c_out, 1)

    in_b, out_b = cdt.itemsize, odt.itemsize
    tm_eff = _select_tm(m, n, c_in, c_out, in_b, out_b, tm)
    grid = (n, pl.cdiv(m, tm_eff))

    # VMEM footprint: double-buffered activation/output tiles + resident W/bias.
    vmem_needed = (2 * tm_eff * (c_in * in_b + c_out * out_b)
                   + 2 * (c_out * c_in * in_b + c_out * 4))
    vmem_limit = int(min(vmem_needed + (4 << 20), 48 << 20))

    cost = pl.CostEstimate(
        flops=2 * n * m * c_out * c_in,
        transcendentals=0,
        bytes_accessed=(n * c_in * m * in_b            # activations
                        + c_out * c_in * in_b          # weight
                        + c_out * 4                    # bias
                        + n * c_out * m * out_b))      # output (dominant stream)

    out_flat = pl.pallas_call(
        _focus_conv_kernel,
        out_shape=jax.ShapeDtypeStruct((n, c_out, m), odt),
        grid_spec=pl.GridSpec(
            grid=grid,
            in_specs=[
                pl.BlockSpec((None, c_in, tm_eff), lambda b, i: (b, 0, i)),
                pl.BlockSpec((c_out, c_in), lambda b, i: (0, 0)),
                pl.BlockSpec((c_out, 1), lambda b, i: (0, 0)),
            ],
            out_specs=pl.BlockSpec((None, c_out, tm_eff), lambda b, i: (b, 0, i)),
        ),
        compiler_params=pltpu.CompilerParams(
            dimension_semantics=("parallel", "parallel"),
            vmem_limit_bytes=vmem_limit),
        cost_estimate=cost,
    )(xs, wm, bias2d)

    # (N, Cout, M) -> (N, Cout, H2, W2): pure reshape, no transpose.
    return out_flat.reshape(n, c_out, h2, w2)


def _reference(x, w, bn_gamma, bn_beta, bn_mean, bn_var, eps=1e-5):
    # pure-JAX reference for sanity check
    xs = _space_to_depth(x)                                        # (N, 4C1, H2, W2)
    y = jnp.einsum("nchw,oc->nohw", xs, w)                         # 1x1 conv
    inv = bn_gamma / jnp.sqrt(bn_var + eps)
    y = y * inv.reshape(1, -1, 1, 1) + (bn_beta - bn_mean * inv).reshape(1, -1, 1, 1)
    return y * jnp.clip(y + 3.0, 0.0, 6.0) / 6.0


if __name__ == "__main__":
    key = jax.random.PRNGKey(0)
    k_x, k_w, k_g, k_b, k_m, k_v, k_x2, k_w2 = jax.random.split(key, 8)

    # ---- small exactness check (f32, single tile, M < 128) ----
    N, C1, H, W = 2, 4, 16, 16
    C2 = 8
    x = jax.random.normal(k_x, (N, C1, H, W), dtype=jnp.float32)
    w = 0.1 * jax.random.normal(k_w, (C2, 4 * C1), dtype=jnp.float32)
    bn_gamma = 1.0 + 0.05 * jax.random.normal(k_g, (C2,), dtype=jnp.float32)
    bn_beta = 0.05 * jax.random.normal(k_b, (C2,), dtype=jnp.float32)
    bn_mean = 0.05 * jax.random.normal(k_m, (C2,), dtype=jnp.float32)
    bn_var = jnp.abs(1.0 + 0.05 * jax.random.normal(k_v, (C2,), dtype=jnp.float32))

    ref = _reference(x, w, bn_gamma, bn_beta, bn_mean, bn_var)
    out = jax.block_until_ready(focus_forward(x, w, bn_gamma, bn_beta, bn_mean, bn_var))
    assert out.shape == (N, C2, H // 2, W // 2), out.shape
    assert jnp.allclose(out, ref, atol=1e-5, rtol=1e-5), float(jnp.max(jnp.abs(out - ref)))

    # ---- bf16 compute + bf16 output (halves both dominant HBM streams) ----
    out_bf16 = jax.block_until_ready(
        focus_forward(x, w, bn_gamma, bn_beta, bn_mean, bn_var,
                      compute_dtype=jnp.bfloat16, out_dtype=jnp.bfloat16))
    assert out_bf16.shape == (N, C2, H // 2, W // 2), out_bf16.shape
    assert out_bf16.dtype == jnp.bfloat16
    assert jnp.allclose(out_bf16.astype(jnp.float32), ref, atol=5e-2, rtol=5e-2), \
        float(jnp.max(jnp.abs(out_bf16.astype(jnp.float32) - ref)))

    # ---- multi-tile / pipelined path (N=1 -> spatial axis split across >=2 tiles) ----
    N2, C1b, Hb, Wb, C2b = 1, 3, 64, 80, 32
    x2 = jax.random.normal(k_x2, (N2, C1b, Hb, Wb), dtype=jnp.float32)
    w2 = 0.1 * jax.random.normal(k_w2, (C2b, 4 * C1b), dtype=jnp.float32)
    g2 = jnp.ones((C2b,), jnp.float32)
    b2 = jnp.zeros((C2b,), jnp.float32)
    m2 = jnp.zeros((C2b,), jnp.float32)
    v2 = jnp.ones((C2b,), jnp.float32)
    ref2 = _reference(x2, w2, g2, b2, m2, v2)
    out2 = jax.block_until_ready(focus_forward(x2, w2, g2, b2, m2, v2, tm=512))
    assert out2.shape == (N2, C2b, Hb // 2, Wb // 2), out2.shape
    assert jnp.allclose(out2, ref2, atol=1e-4, rtol=1e-4), \
        float(jnp.max(jnp.abs(out2 - ref2)))

    print("KERNEL_OK")
</pallas_src>

<mosaic_0001>
module attributes {stable_mosaic.version = 11 : i64} {
  func.func @_focus_conv_kernel(%arg0: i32, %arg1: i32, %arg2: memref<1x16x64xf32, #tpu.memory_space<vmem>>, %arg3: memref<8x16xf32, #tpu.memory_space<vmem>>, %arg4: memref<8x1xf32, #tpu.memory_space<vmem>>, %arg5: memref<1x8x64xf32, #tpu.memory_space<vmem>>) attributes {dimension_semantics = [#tpu.dimension_semantics<parallel>, #tpu.dimension_semantics<parallel>], iteration_bounds = array<i64: 2, 1>, scalar_prefetch = 0 : i64, scratch_operands = 0 : i64, tpu.core_type = #tpu.core_type<tc>, window_params = [{transform_indices = @transform_0, window_bounds = array<i64: 1, 16, 64>}, {pipeline_mode = #tpu.pipeline_mode<synchronous>, transform_indices = @transform_1, window_bounds = array<i64: 8, 16>}, {pipeline_mode = #tpu.pipeline_mode<synchronous>, transform_indices = @transform_2, window_bounds = array<i64: 8, 1>}, {transform_indices = @transform_3, window_bounds = array<i64: 1, 8, 64>}]} {
    %c0 = arith.constant 0 : index
    %c0_0 = arith.constant 0 : index
    %0 = vector.load %arg3[%c0, %c0_0] : memref<8x16xf32, #tpu.memory_space<vmem>>, vector<8x16xf32>
    %c0_1 = arith.constant 0 : index
    %c0_2 = arith.constant 0 : index
    %c0_3 = arith.constant 0 : index
    %1 = vector.load %arg2[%c0_1, %c0_2, %c0_3] : memref<1x16x64xf32, #tpu.memory_space<vmem>>, vector<1x16x64xf32>
    %2 = vector.shape_cast %1 : vector<1x16x64xf32> to vector<16x64xf32>
    %cst = arith.constant dense<0.000000e+00> : vector<8x64xf32>
    %3 = tpu.matmul %0, %2, %cst {dimension_numbers = #tpu.dot_dimension_numbers<[1], [0], [0], [1], [0, 0, 1, 1], [], []>} : vector<8x16xf32>, vector<16x64xf32>, vector<8x64xf32> -> vector<8x64xf32>
    %c0_4 = arith.constant 0 : index
    %c0_5 = arith.constant 0 : index
    %4 = vector.load %arg4[%c0_4, %c0_5] : memref<8x1xf32, #tpu.memory_space<vmem>>, vector<8x1xf32>
    %5 = vector.broadcast %4 : vector<8x1xf32> to vector<8x64xf32>
    %6 = arith.addf %3, %5 : vector<8x64xf32>
    %cst_6 = arith.constant 3.000000e+00 : f32
    %7 = vector.broadcast %cst_6 : f32 to vector<8x64xf32>
    %8 = arith.addf %6, %7 : vector<8x64xf32>
    %cst_7 = arith.constant 0.000000e+00 : f32
    %cst_8 = arith.constant 6.000000e+00 : f32
    %9 = vector.broadcast %cst_7 : f32 to vector<8x64xf32>
    %10 = arith.maximumf %9, %8 : vector<8x64xf32>
    %11 = vector.broadcast %cst_8 : f32 to vector<8x64xf32>
    %12 = arith.minimumf %11, %10 : vector<8x64xf32>
    %13 = arith.mulf %6, %12 : vector<8x64xf32>
    %cst_9 = arith.constant 0.166666672 : f32
    %14 = vector.broadcast %cst_9 : f32 to vector<8x64xf32>
    %15 = arith.mulf %13, %14 : vector<8x64xf32>
    %c0_10 = arith.constant 0 : index
    %c0_11 = arith.constant 0 : index
    %c0_12 = arith.constant 0 : index
    %16 = vector.load %arg5[%c0_10, %c0_11, %c0_12] : memref<1x8x64xf32, #tpu.memory_space<vmem>>, vector<1x8x64xf32>
    %17 = vector.shape_cast %16 : vector<1x8x64xf32> to vector<8x64xf32>
    %18 = vector.shape_cast %15 : vector<8x64xf32> to vector<1x8x64xf32>
    tpu.vector_store %arg5[%c0_10, %c0_11, %c0_12], %18 {strides = array<i32>} : memref<1x8x64xf32, #tpu.memory_space<vmem>>, vector<1x8x64xf32>,
    return
  }
  func.func @transform_0(%arg0: i32, %arg1: i32) -> (i32, i32, i32) {
    %c0_i32 = arith.constant 0 : i32
    %c0_i32_0 = arith.constant 0 : i32
    return %arg0, %c0_i32, %arg1 : i32, i32, i32
  }
  func.func @transform_1(%arg0: i32, %arg1: i32) -> (i32, i32) {
    %c0_i32 = arith.constant 0 : i32
    %c0_i32_0 = arith.constant 0 : i32
    %c0_i32_1 = arith.constant 0 : i32
    return %c0_i32, %c0_i32_0 : i32, i32
  }
  func.func @transform_2(%arg0: i32, %arg1: i32) -> (i32, i32) {
    %c0_i32 = arith.constant 0 : i32
    %c0_i32_0 = arith.constant 0 : i32
    %c0_i32_1 = arith.constant 0 : i32
    return %c0_i32, %c0_i32_0 : i32, i32
  }
  func.func @transform_3(%arg0: i32, %arg1: i32) -> (i32, i32, i32) {
    %c0_i32 = arith.constant 0 : i32
    %c0_i32_0 = arith.constant 0 : i32
    return %arg0, %c0_i32, %arg1 : i32, i32, i32
  }
}

</mosaic_0001>

<bundles_post_ra>
// kernel: focus_forward.1
= control target key start
LH: loop header
LB: loop body
LE: loop exit
PB: predicated region body
PF: predicated region fallthrough
CT: control target
= control target key end

     0   :  { %s469_s12 = smov 0   ;;  %s471_s13 = smov 0   ;;  %s508_s0 = inlined_call_operand.vmem [shape: f32[2,16,64], index: 0, kind: input, shape index: {}]   ;;  %s509_s1 = inlined_call_operand.vmem [shape: f32[8,16], index: 1, kind: input, shape index: {}]   ;;  %s510_s2 = inlined_call_operand.vmem [shape: f32[8,1], index: 2, kind: input, shape index: {}]   ;;  %s511_s3 = inlined_call_operand.vmem [shape: f32[2,8,64], index: 3, kind: output, shape index: {}]  }
   0x1   :  { %s473_s14 = smov 0  }
   0x2 LB: > { %s25_s15 = sadd.s32 1, %s439_s13  ;;  %p371_p0 = scmp.ge.s32.totalorder %s443_s14, 1  ;;  %s443_s14 = sphi %s473_s14, %s13_s14   ;;  %s439_s13 = sphi %s471_s13, %s513_s13   ;;  %s435_s12 = sphi %s469_s12, %s512_s12  }
   0x3   : > { %p27_p1 = scmp.ge.s32.totalorder %s25_s15, 2  ;;  %p156_p2 = scmp.lt.s32.totalorder %s443_s14, 3 }
   0x5   : > { %s515_s15 = smov (%p27_p1, %s25_s15), 0  ;;  %p157_p3 = pnand %p371_p0, %p156_p2 }
   0x6   : > { %p185_p4 = scmp.lt.s32.totalorder (!%p157_p3), %s435_s12, 1  ;;  %v445_v0 = vmov (!%p157_p3), 0.0|0.0   ;;  %vm446_vm0 = vmmov (!%p157_p3), 0   ;;  %v447_v1 = vmov (!%p157_p3), 0.0   ;;  %v203_v2 = vld [vmem:[%s510_s2] sm:$0xff] (!%p157_p3)  ;;  %v448_v3 = vmov (!%p157_p3), 0  }
   0x7   : > { %160 = sbr.rel (%p157_p3) target bundleno = 248 (0xf8), region = 32  ;;  %389 = vmatprep.subr.bf16.mxu0 (!%p157_p3), %v445_v0  ;;  %386 = vmatprep.mubr.msk.f32.mxu0 (!%p157_p3), %vm446_vm0, %v447_v1  ;;  %v200_v7 = vld [vmem:[%s509_s1] sm:$0xff] (!%p157_p3)  ;;  %vm209_vm1 = vcmask (!%p157_p3), 130048   ;;  %vm288_vm2 = vcmask (!%p157_p3), 523264  }
   0x8   : > { %420 = vset.pattern.permute.xlu0 (!%p157_p3), %v448_v3 }
   0x9   : > { %206 = vperm.xlu0 (!%p157_p3), %420, %v203_v2  }
   0xe   : > { %s517_s12 = smov (!%p185_p4, %s435_s12), 1 }
   0xf   : > { %s378_s18 = sshll.u32 %s517_s12, 4  ;;  %s374_s24 = sshll.u32 %s517_s12, 3 }
  0x10   : > { %s192_s21 = scalar_lea.vmem %s508_s0, %s378_s18  ;;  %s199_s27 = scalar_lea.vmem %s511_s3, %s374_s24 }
  0x11   : > { %v201_v4 = vld [vmem:[%s192_s21] sm:$0xff]  ;;  %v202_v5 = vld [vmem:[%s192_s21 + $0x8] sm:$0xff] }
  0x12   : > { %v390_v6 = vpack.c.bf16 %v202_v5, %v201_v4 }
  0x14   : > { %391 = vmatpush3.bf16.msra.mxu0 %v390_v6 }
  0x17   : > { %387 = vmatmul.mubr.msk.f32.vlgmr.msra.gmra.mrb[0].mxu0 %vm209_vm1, %v200_v7 }
  0x88   : > { %v207_v8 = vpop.permute.xlu0 %206 }
  0xea   : > { %v279_v9 = vpop.f32.mrb[0].mxu0 }
  0xeb   : > { %v280_v10 = vadd.f32 %v279_v9, %v207_v8  ;;  %v388_v11 = vpop.f32.mrb[1].mxu0 }
  0xed   : > { %v283_v12 = vadd.f32 3.0, %v280_v10 }
  0xef   : > { %v284_v13 = vmax.f32 %v283_v12, 0.0 }
  0xf1   : > { %v285_v14 = vmin.f32 %v284_v13, 6.0 }
  0xf3   : > { %v286_v15 = vmul.f32 %v285_v14, %v280_v10 }
  0xf5   : > { %v287_v16 = vmul.f32 0.16666667, %v286_v15 }
  0xf7   : > { %289 = vst.msk [vmem:[%s199_s27] sm:$0xff] %vm288_vm2, %v287_v16 }
  0xf8 PF: > { %s13_s14 = sadd.s32 1, %s443_s14   ;;  %s512_s12 = smov %s439_s13 }
  0xf9   : > { %p10_p5 = scmp.ge.s32.totalorder %s13_s14, 4   ;;  %s513_s13 = smov %s515_s15 }
  0xfb   :  { %12 = sbr.rel (!%p10_p5) target bundleno = 2 (0x2), region = 62 }

</bundles_post_ra>
